<compile_context>
chip_gen: v6e
topology: v6e:2x2x1
jax: 0.10.0
libtpu: 0.0.40
codegen_flags: <defaults>
</compile_context>

<pallas_src>
import jax
import jax.numpy as jnp
from jax import lax
from jax.experimental import pallas as pl
from jax.experimental.pallas import tpu as pltpu

LN_EPS = 1e-5
_INV_SQRT2 = 0.7071067811865476


def _demux_kernel(x_ref, kproj_ref, w1x_ref, w2_ref, b2_ref, gamma_ref, beta_ref,
                  o_ref, hx_ref):
    s = pl.program_id(1)                       # stream index (inner, sequential)

    # x @ W1[:d_model] does not depend on the stream: compute once per row tile.
    @pl.when(s == 0)
    def _():
        hx_ref[...] = jnp.dot(x_ref[...], w1x_ref[...],
                              preferred_element_type=jnp.float32)

    # Fused concat: [x, key] @ W1 + b1 == (x @ W1[:d_model]) + (key @ W1[d_model:] + b1)
    h = hx_ref[...] + kproj_ref[0]             # (tm, d_in) + (1, d_in)

    # Exact GELU (PyTorch default: erf-based)
    h = 0.5 * h * (1.0 + lax.erf(h * _INV_SQRT2))

    # Second linear
    y = jnp.dot(h, w2_ref[...], preferred_element_type=jnp.float32) + b2_ref[...]

    # LayerNorm over the last dim (single-pass variance; rsqrt on EUP)
    mean = jnp.mean(y, axis=-1, keepdims=True)
    mean_sq = jnp.mean(y * y, axis=-1, keepdims=True)
    var = mean_sq - mean * mean
    y_norm = (y - mean) * lax.rsqrt(var + LN_EPS)
    o_ref[0] = (y_norm * gamma_ref[...] + beta_ref[...]).astype(o_ref.dtype)


def _pick_tm(n_rows, tm_req):
    """Largest multiple-of-8 divisor of n_rows that is <= tm_req."""
    tm = max(8, min(tm_req, n_rows))
    tm -= tm % 8
    while tm > 8 and n_rows % tm != 0:
        tm -= 8
    return tm


def demultiplexer_forward(x, keys, w1, b1, w2, b2, gamma, beta, *, tm=512):
    """x: (B, T, d_model); keys: (S, dim_key); w1: (d_in, d_in); w2: (d_in, d_model).

    Weight layout is (in_features, out_features); layer computes x @ W + b.
    """
    B, T, d_model = x.shape
    S, dim_key = keys.shape
    d_in = d_model + dim_key
    N = B * T
    assert N % 8 == 0, "B*T must be a multiple of 8 (sublane constraint)"
    tm = _pick_tm(N, tm)

    x2 = x.reshape(N, d_model)
    w1x = w1[:d_model, :]                                   # (d_model, d_in)
    # Hoisted, stream-only dependent projection of the keys through W1 + bias.
    kproj = (keys @ w1[d_model:, :] + b1).reshape(S, 1, d_in)
    b2_2 = b2.reshape(1, d_model)
    g_2 = gamma.reshape(1, d_model)
    be_2 = beta.reshape(1, d_model)

    grid = (N // tm, S)                                     # rows outer, streams inner

    # VMEM budget (f32 bytes):
    #   resident weights/vectors + double-buffered x / kproj / out tiles + hx scratch.
    est_bytes = 4 * (
        d_model * d_in + d_in * d_model + 3 * d_model       # W1x, W2, b2/gamma/beta
        + 2 * tm * d_model                                  # x tile, double-buffered
        + 2 * d_in                                          # kproj tile, double-buffered
        + 2 * tm * d_model                                  # out tile, double-buffered
        + tm * d_in                                         # hx scratch
    )
    vmem_limit = int(min(max(2 * est_bytes, 32 << 20), 64 << 20))  # v7x-safe cap

    out = pl.pallas_call(
        _demux_kernel,
        out_shape=jax.ShapeDtypeStruct((S, N, d_model), x.dtype),
        grid_spec=pltpu.PrefetchScalarGridSpec(
            num_scalar_prefetch=0,
            grid=grid,
            in_specs=[
                pl.BlockSpec((tm, d_model), lambda r, s: (r, 0)),      # x rows (resident over s)
                pl.BlockSpec((1, 1, d_in), lambda r, s: (s, 0, 0)),    # key projection
                pl.BlockSpec((d_model, d_in), lambda r, s: (0, 0)),    # W1[:d_model]
                pl.BlockSpec((d_in, d_model), lambda r, s: (0, 0)),    # W2
                pl.BlockSpec((1, d_model), lambda r, s: (0, 0)),       # b2
                pl.BlockSpec((1, d_model), lambda r, s: (0, 0)),       # gamma
                pl.BlockSpec((1, d_model), lambda r, s: (0, 0)),       # beta
            ],
            out_specs=pl.BlockSpec((1, tm, d_model), lambda r, s: (s, r, 0)),
            scratch_shapes=[pltpu.VMEM((tm, d_in), jnp.float32)],      # cached x @ W1x
        ),
        compiler_params=pltpu.CompilerParams(
            dimension_semantics=("parallel", "arbitrary"),
            vmem_limit_bytes=vmem_limit),
    )(x2, kproj, w1x, w2, b2_2, g_2, be_2)

    return out.reshape(S, B, T, d_model)


def _reference(x, keys, w1, b1, w2, b2, gamma, beta):
    B, T, d_model = x.shape
    S, dim_key = keys.shape
    key_exp = jnp.broadcast_to(keys[:, None, None, :], (S, B, T, dim_key))
    xc = jnp.concatenate(
        [jnp.broadcast_to(x[None], (S, B, T, d_model)), key_exp], axis=-1)
    h = xc @ w1 + b1
    h = 0.5 * h * (1.0 + lax.erf(h * _INV_SQRT2))
    y = h @ w2 + b2
    mean = jnp.mean(y, axis=-1, keepdims=True)
    var = jnp.mean((y - mean) ** 2, axis=-1, keepdims=True)
    return (y - mean) * lax.rsqrt(var + LN_EPS) * gamma + beta


if __name__ == "__main__":
    # Small shapes consistent with the module
    n_streams, B, T, d_model = 3, 2, 8, 32
    dim_key = d_model // 4           # 8
    d_in = d_model + dim_key         # 40

    root = jax.random.PRNGKey(0)
    k_keys, k_w1, k_b1, k_w2, k_b2, k_x = jax.random.split(root, 6)

    # Deterministic synthetic parameters (no checkpoint load)
    keys = jax.random.normal(k_keys, (n_streams, dim_key), jnp.float32)
    w1 = jax.random.normal(k_w1, (d_in, d_in), jnp.float32) * 0.1   # (in, out) layout
    b1 = jax.random.normal(k_b1, (d_in,), jnp.float32) * 0.1
    w2 = jax.random.normal(k_w2, (d_in, d_model), jnp.float32) * 0.1
    b2 = jax.random.normal(k_b2, (d_model,), jnp.float32) * 0.1
    gamma = jnp.ones((d_model,), jnp.float32)                       # LayerNorm default init
    beta = jnp.zeros((d_model,), jnp.float32)

    x = jax.random.normal(k_x, (B, T, d_model), jnp.float32)

    out = demultiplexer_forward(x, keys, w1, b1, w2, b2, gamma, beta)
    out = jax.block_until_ready(out)

    ref = _reference(x, keys, w1, b1, w2, b2, gamma, beta)
    assert out.shape == (n_streams, B, T, d_model)
    assert jnp.allclose(out, ref, atol=1e-4, rtol=1e-4), "mismatch vs reference"

    print("KERNEL_OK")
</pallas_src>

<mosaic_0001>
module attributes {stable_mosaic.version = 11 : i64} {
  func.func @_demux_kernel(%arg0: i32, %arg1: i32, %arg2: memref<16x32xf32, #tpu.memory_space<vmem>>, %arg3: memref<1x1x40xf32, #tpu.memory_space<vmem>>, %arg4: memref<32x40xf32, #tpu.memory_space<vmem>>, %arg5: memref<40x32xf32, #tpu.memory_space<vmem>>, %arg6: memref<1x32xf32, #tpu.memory_space<vmem>>, %arg7: memref<1x32xf32, #tpu.memory_space<vmem>>, %arg8: memref<1x32xf32, #tpu.memory_space<vmem>>, %arg9: memref<1x16x32xf32, #tpu.memory_space<vmem>>, %arg10: memref<16x40xf32, #tpu.memory_space<vmem>>) attributes {dimension_semantics = [#tpu.dimension_semantics<parallel>, #tpu.dimension_semantics<arbitrary>], iteration_bounds = array<i64: 1, 3>, scalar_prefetch = 0 : i64, scratch_operands = 1 : i64, tpu.core_type = #tpu.core_type<tc>, window_params = [{transform_indices = @transform_0, window_bounds = array<i64: 16, 32>}, {transform_indices = @transform_1, window_bounds = array<i64: 1, 1, 40>}, {pipeline_mode = #tpu.pipeline_mode<synchronous>, transform_indices = @transform_2, window_bounds = array<i64: 32, 40>}, {pipeline_mode = #tpu.pipeline_mode<synchronous>, transform_indices = @transform_3, window_bounds = array<i64: 40, 32>}, {pipeline_mode = #tpu.pipeline_mode<synchronous>, transform_indices = @transform_4, window_bounds = array<i64: 1, 32>}, {pipeline_mode = #tpu.pipeline_mode<synchronous>, transform_indices = @transform_5, window_bounds = array<i64: 1, 32>}, {pipeline_mode = #tpu.pipeline_mode<synchronous>, transform_indices = @transform_6, window_bounds = array<i64: 1, 32>}, {transform_indices = @transform_7, window_bounds = array<i64: 1, 16, 32>}]} {
    %c0_i32 = arith.constant 0 : i32
    %0 = arith.cmpi eq, %arg1, %c0_i32 : i32
    %1 = arith.extui %0 : i1 to i32
    %c0_i32_0 = arith.constant 0 : i32
    %2 = arith.cmpi ne, %1, %c0_i32_0 : i32
    scf.if %2 {
      %c0_24 = arith.constant 0 : index
      %c0_25 = arith.constant 0 : index
      %48 = vector.load %arg2[%c0_24, %c0_25] : memref<16x32xf32, #tpu.memory_space<vmem>>, vector<16x32xf32>
      %c0_26 = arith.constant 0 : index
      %c0_27 = arith.constant 0 : index
      %49 = vector.load %arg4[%c0_26, %c0_27] : memref<32x40xf32, #tpu.memory_space<vmem>>, vector<32x40xf32>
      %cst_28 = arith.constant dense<0.000000e+00> : vector<16x40xf32>
      %50 = tpu.matmul %48, %49, %cst_28 {dimension_numbers = #tpu.dot_dimension_numbers<[1], [0], [0], [1], [0, 0, 1, 1], [], []>} : vector<16x32xf32>, vector<32x40xf32>, vector<16x40xf32> -> vector<16x40xf32>
      %c0_29 = arith.constant 0 : index
      %c0_30 = arith.constant 0 : index
      %51 = vector.load %arg10[%c0_29, %c0_30] : memref<16x40xf32, #tpu.memory_space<vmem>>, vector<16x40xf32>
      tpu.vector_store %arg10[%c0_29, %c0_30], %50 {strides = array<i32>} : memref<16x40xf32, #tpu.memory_space<vmem>>, vector<16x40xf32>,
    } else {
    }
    %c0 = arith.constant 0 : index
    %c0_1 = arith.constant 0 : index
    %3 = vector.load %arg10[%c0, %c0_1] : memref<16x40xf32, #tpu.memory_space<vmem>>, vector<16x40xf32>
    %c0_2 = arith.constant 0 : index
    %c0_3 = arith.constant 0 : index
    %c0_4 = arith.constant 0 : index
    %4 = vector.load %arg3[%c0_2, %c0_3, %c0_4] : memref<1x1x40xf32, #tpu.memory_space<vmem>>, vector<1x1x40xf32>
    %5 = vector.shape_cast %4 : vector<1x1x40xf32> to vector<1x40xf32>
    %6 = vector.broadcast %5 : vector<1x40xf32> to vector<16x40xf32>
    %7 = arith.addf %3, %6 : vector<16x40xf32>
    %cst = arith.constant 5.000000e-01 : f32
    %8 = vector.broadcast %cst : f32 to vector<16x40xf32>
    %9 = arith.mulf %8, %7 : vector<16x40xf32>
    %cst_5 = arith.constant 0.707106769 : f32
    %10 = vector.broadcast %cst_5 : f32 to vector<16x40xf32>
    %11 = arith.mulf %7, %10 : vector<16x40xf32>
    %12 = math.erf %11 : vector<16x40xf32>
    %cst_6 = arith.constant 1.000000e+00 : f32
    %13 = vector.broadcast %cst_6 : f32 to vector<16x40xf32>
    %14 = arith.addf %13, %12 : vector<16x40xf32>
    %15 = arith.mulf %9, %14 : vector<16x40xf32>
    %c0_7 = arith.constant 0 : index
    %c0_8 = arith.constant 0 : index
    %16 = vector.load %arg5[%c0_7, %c0_8] : memref<40x32xf32, #tpu.memory_space<vmem>>, vector<40x32xf32>
    %cst_9 = arith.constant dense<0.000000e+00> : vector<16x32xf32>
    %17 = tpu.matmul %15, %16, %cst_9 {dimension_numbers = #tpu.dot_dimension_numbers<[1], [0], [0], [1], [0, 0, 1, 1], [], []>} : vector<16x40xf32>, vector<40x32xf32>, vector<16x32xf32> -> vector<16x32xf32>
    %c0_10 = arith.constant 0 : index
    %c0_11 = arith.constant 0 : index
    %18 = vector.load %arg6[%c0_10, %c0_11] : memref<1x32xf32, #tpu.memory_space<vmem>>, vector<1x32xf32>
    %19 = vector.broadcast %18 : vector<1x32xf32> to vector<16x32xf32>
    %20 = arith.addf %17, %19 : vector<16x32xf32>
    %cst_12 = arith.constant dense<0.000000e+00> : vector<16xf32>
    %21 = vector.multi_reduction <add>, %20, %cst_12 [1] : vector<16x32xf32> to vector<16xf32>
    %22 = vector.shape_cast %21 : vector<16xf32> to vector<16x1xf32>
    %cst_13 = arith.constant 3.200000e+01 : f32
    %23 = vector.broadcast %cst_13 : f32 to vector<16x1xf32>
    %24 = arith.divf %22, %23 : vector<16x1xf32>
    %25 = arith.mulf %20, %20 : vector<16x32xf32>
    %cst_14 = arith.constant dense<0.000000e+00> : vector<16xf32>
    %26 = vector.multi_reduction <add>, %25, %cst_14 [1] : vector<16x32xf32> to vector<16xf32>
    %27 = vector.shape_cast %26 : vector<16xf32> to vector<16x1xf32>
    %cst_15 = arith.constant 3.200000e+01 : f32
    %28 = vector.broadcast %cst_15 : f32 to vector<16x1xf32>
    %29 = arith.divf %27, %28 : vector<16x1xf32>
    %30 = arith.mulf %24, %24 : vector<16x1xf32>
    %31 = arith.subf %29, %30 : vector<16x1xf32>
    %32 = vector.broadcast %24 : vector<16x1xf32> to vector<16x32xf32>
    %33 = arith.subf %20, %32 : vector<16x32xf32>
    %cst_16 = arith.constant 9.99999974E-6 : f32
    %34 = vector.broadcast %cst_16 : f32 to vector<16x1xf32>
    %35 = arith.addf %31, %34 : vector<16x1xf32>
    %36 = math.rsqrt %35 : vector<16x1xf32>
    %37 = vector.broadcast %36 : vector<16x1xf32> to vector<16x32xf32>
    %38 = arith.mulf %33, %37 : vector<16x32xf32>
    %c0_17 = arith.constant 0 : index
    %c0_18 = arith.constant 0 : index
    %39 = vector.load %arg7[%c0_17, %c0_18] : memref<1x32xf32, #tpu.memory_space<vmem>>, vector<1x32xf32>
    %40 = vector.broadcast %39 : vector<1x32xf32> to vector<16x32xf32>
    %41 = arith.mulf %38, %40 : vector<16x32xf32>
    %c0_19 = arith.constant 0 : index
    %c0_20 = arith.constant 0 : index
    %42 = vector.load %arg8[%c0_19, %c0_20] : memref<1x32xf32, #tpu.memory_space<vmem>>, vector<1x32xf32>
    %43 = vector.broadcast %42 : vector<1x32xf32> to vector<16x32xf32>
    %44 = arith.addf %41, %43 : vector<16x32xf32>
    %c0_21 = arith.constant 0 : index
    %c0_22 = arith.constant 0 : index
    %c0_23 = arith.constant 0 : index
    %45 = vector.load %arg9[%c0_21, %c0_22, %c0_23] : memref<1x16x32xf32, #tpu.memory_space<vmem>>, vector<1x16x32xf32>
    %46 = vector.shape_cast %45 : vector<1x16x32xf32> to vector<16x32xf32>
    %47 = vector.shape_cast %44 : vector<16x32xf32> to vector<1x16x32xf32>
    tpu.vector_store %arg9[%c0_21, %c0_22, %c0_23], %47 {strides = array<i32>} : memref<1x16x32xf32, #tpu.memory_space<vmem>>, vector<1x16x32xf32>,
    return
  }
  func.func @transform_0(%arg0: i32, %arg1: i32) -> (i32, i32) {
    %c0_i32 = arith.constant 0 : i32
    %c0_i32_0 = arith.constant 0 : i32
    return %arg0, %c0_i32 : i32, i32
  }
  func.func @transform_1(%arg0: i32, %arg1: i32) -> (i32, i32, i32) {
    %c0_i32 = arith.constant 0 : i32
    %c0_i32_0 = arith.constant 0 : i32
    %c0_i32_1 = arith.constant 0 : i32
    return %arg1, %c0_i32, %c0_i32_0 : i32, i32, i32
  }
  func.func @transform_2(%arg0: i32, %arg1: i32) -> (i32, i32) {
    %c0_i32 = arith.constant 0 : i32
    %c0_i32_0 = arith.constant 0 : i32
    %c0_i32_1 = arith.constant 0 : i32
    return %c0_i32, %c0_i32_0 : i32, i32
  }
  func.func @transform_3(%arg0: i32, %arg1: i32) -> (i32, i32) {
    %c0_i32 = arith.constant 0 : i32
    %c0_i32_0 = arith.constant 0 : i32
    %c0_i32_1 = arith.constant 0 : i32
    return %c0_i32, %c0_i32_0 : i32, i32
  }
  func.func @transform_4(%arg0: i32, %arg1: i32) -> (i32, i32) {
    %c0_i32 = arith.constant 0 : i32
    %c0_i32_0 = arith.constant 0 : i32
    %c0_i32_1 = arith.constant 0 : i32
    return %c0_i32, %c0_i32_0 : i32, i32
  }
  func.func @transform_5(%arg0: i32, %arg1: i32) -> (i32, i32) {
    %c0_i32 = arith.constant 0 : i32
    %c0_i32_0 = arith.constant 0 : i32
    %c0_i32_1 = arith.constant 0 : i32
    return %c0_i32, %c0_i32_0 : i32, i32
  }
  func.func @transform_6(%arg0: i32, %arg1: i32) -> (i32, i32) {
    %c0_i32 = arith.constant 0 : i32
    %c0_i32_0 = arith.constant 0 : i32
    %c0_i32_1 = arith.constant 0 : i32
    return %c0_i32, %c0_i32_0 : i32, i32
  }
  func.func @transform_7(%arg0: i32, %arg1: i32) -> (i32, i32, i32) {
    %c0_i32 = arith.constant 0 : i32
    %c0_i32_0 = arith.constant 0 : i32
    return %arg1, %arg0, %c0_i32 : i32, i32, i32
  }
}

</mosaic_0001>

<bundles_post_ra>
// kernel: tpu_custom_call.1
= control target key start
LH: loop header
LB: loop body
LE: loop exit
PB: predicated region body
PF: predicated region fallthrough
CT: control target
= control target key end

     0   :  { %12 = vsyncpa [#allocation4], 0  ;;  %s1096_s0 = inlined_call_operand.vmem [shape: f32[16,32], index: 0, kind: input, shape index: {}]   ;;  %s1097_s1 = inlined_call_operand.vmem [shape: f32[3,1,40], index: 1, kind: input, shape index: {}]   ;;  %s1098_s2 = inlined_call_operand.vmem [shape: f32[32,40], index: 2, kind: input, shape index: {}]   ;;  %s1099_s3 = inlined_call_operand.vmem [shape: f32[40,32], index: 3, kind: input, shape index: {}]   ;;  %s1100_s4 = inlined_call_operand.vmem [shape: f32[1,32], index: 4, kind: input, shape index: {}]   ;;  %s1101_s5 = inlined_call_operand.vmem [shape: f32[1,32], index: 5, kind: input, shape index: {}]   ;;  %s1102_s6 = inlined_call_operand.vmem [shape: f32[1,32], index: 6, kind: input, shape index: {}]   ;;  %s1103_s7 = inlined_call_operand.hbm [shape: f32[3,16,32], index: 7, kind: output, shape index: {}]  }
   0x1   :  { %14 = vsyncpa [#allocation4 + $0x1], 0  ;;  %s916_s24 = smov 0   ;;  %s918_s25 = smov 0  }
   0x2   :  { %s920_s26 = smov 0   ;;  %s922_s27 = smov 0  }
   0x3   :  { %s924_s28 = smov 0   ;;  %s926_s29 = smov 0  }
   0x4 LB: > { %s671_s30 = sadd.s32 4294967295, %s871_s29   ;;  %s672_s8 = sadd.s32 4294967294, %s871_s29   ;;  %s871_s29 = sphi %s926_s29, %s20_s29   ;;  %s867_s28 = sphi %s924_s28, %s1110_s28   ;;  %s863_s27 = sphi %s922_s27, %s1109_s27   ;;  %s859_s26 = sphi %s920_s26, %s1108_s26   ;;  %s855_s25 = sphi %s918_s25, %s1107_s25   ;;  %s851_s24 = sphi %s916_s24, %s1106_s24  }
   0x5   : > { %s29_s9 = sadd.s32 1, %s867_s28  ;;  %s198_s10 = sadd.s32 1, %s859_s26 }
   0x6   : > { %p30_p0 = scmp.ge.s32.totalorder %s29_s9, 3  ;;  %p208_p1 = scmp.ne.s32.totalorder %s859_s26, %s855_s25 }
   0x7   : > { %p209_p2 = scmp.eq.s32.totalorder %s671_s30, 2  ;;  %p214_p3 = scmp.ne.s32.totalorder %s855_s25, %s851_s24 }
   0x8   : > { %s1112_s9 = smov (%p30_p0, %s29_s9), 0  ;;  %p215_p5 = scmp.eq.s32.totalorder %s672_s8, 2 }
   0x9   : > { %p956_p4 = por %p209_p2, %p208_p1  ;;  %s193_s12 = ssub.s32 %s867_s28, %s1112_s9 }
   0xa   : > { %p676_p6 = scmp.ge.s32.totalorder %s871_s29, 1  ;;  %p196_p7 = scmp.eq.s32.totalorder %s193_s12, 0 }
   0xb   : > { %p963_p8 = por %p215_p5, %p214_p3  ;;  %p263_p9 = scmp.lt.s32.totalorder %s871_s29, 4 }
   0xc   : > { %s969_s14 = scalar_select %p196_p7, %s859_s26, %s198_s10  }
   0xd   : > { %p264_p10 = pnand %p676_p6, %p263_p9 }
   0xe   : > { %s295_s15 = sand.u32 (!%p264_p10), 1, %s855_s25   ;;  %p304_p11 = scmp.lt.s32.totalorder (!%p264_p10), %s863_s27, 2 }
   0xf   : > { %267 = sbr.rel (%p264_p10) target bundleno = 643 (0x283), region = 48  ;;  %s677_s16 = sshll.u32 (!%p264_p10), %s295_s15, 4 }
  0x10   : > { %s982_s21 = scalar_lea.vmem (!%p264_p10), [#allocation3], %s677_s16  ;;  %p678_p12 = scmp.ne.s32.totalorder (!%p264_p10), %s863_s27, 0 }
  0x14   : > { %s976_s17 = scalar_select %p304_p11, %s863_s27, 2 }
  0x15   : > { %311 = sbr.rel (%p678_p12) target bundleno = 231 (0xe7), region = 52 }
  0x16   : > { %s306_s20 = scalar_lea.vmem %s1097_s1, %s976_s17 }
  0x1a   : > { %v317_v0 = vld [vmem:[%s1098_s2 + $0x18] sm:$0xff]  ;;  %v316_v1 = vld [vmem:[%s1098_s2 + $0x10] sm:$0xff]  ;;  %vm318_vm0 = vcmask 261120   ;;  %v312_v2 = vld [vmem:[%s1096_s0] sm:$0xff]  ;;  %vm400_vm1 = vcmask 326656  }
  0x1b   : > { %706 = vmatprep.subr.mxu0 %v317_v0  ;;  %v315_v3 = vld [vmem:[%s1098_s2 + $0x8] sm:$0xff]  ;;  %714 = vmatprep.mubr.msk.f32.mxu0 %vm318_vm0, %v312_v2  ;;  %v314_v4 = vld [vmem:[%s1098_s2] sm:$0xff] }
  0x1c   : > { %707 = vmatpush3.msra.mxu0 %v317_v0  ;;  %v313_v5 = vld [vmem:[%s1096_s0 + $0x8] sm:$0xff] }
  0x1d   : > { %708 = vmatprep.subr.mxu0 %v316_v1 }
  0x1e   : > { %709 = vmatpush3.msra.mxu0 %v316_v1 }
  0x1f   : > { %710 = vmatprep.subr.mxu0 %v315_v3 }
  0x20   : > { %711 = vmatpush3.msra.mxu0 %v315_v3 }
  0x21   : > { %712 = vmatprep.subr.mxu0 %v314_v4 }
  0x22   : > { %713 = vmatpush3.msra.mxu0 %v314_v4 }
  0x23   : > { %715 = vmatmul.mubr.msk.f32.vlgmr.msra.gmra.mxu0 %vm318_vm0, %v313_v5 }
  0xe3   : > { %v716_v6 = vpop.f32.mrf.mxu0 }
  0xe4   : > { %402 = vst.msk [vmem:[#allocation2 + $0x8] sm:$0xff] %vm400_vm1, %v716_v6 }
  0xe5   : > { %v391_v7 = vpop.f32.mrf.mxu0 }
  0xe6   : > { %401 = vst.msk [vmem:[#allocation2] sm:$0xff] %vm400_vm1, %v391_v7 }
  0xe7 PF: > { %v428_v8 = vld [vmem:[%s1099_s3 + $0x20] sm:$0xff]  ;;  %v427_v9 = vld [vmem:[%s1099_s3 + $0x18] sm:$0xff]  ;;  %v426_v11 = vld [vmem:[%s1099_s3 + $0x10] sm:$0xff]  ;;  %vm436_vm2 = vcmask 326656   ;;  %vm518_vm3 = vcmask 261120   ;;  %s692_s23 = sshll.u32 %s863_s27, 8 }
  0xe8   : > { %717 = vmatprep.subr.mxu0 %v428_v8  ;;  %v681_v13 = vld [vmem:[%s306_s20] ss:$0 sm:$0xff]  ;;  %v425_v16 = vld [vmem:[%s1099_s3 + $0x8] sm:$0xff]  ;;  %s586_s30 = sshll.u32 %s982_s21, 4  ;;  %s1043_s12 = scalar_lea.hbm %s1103_s7, %s692_s23  ;;  %s1045_s30 = int_to_ptr.vmem [resolvable:$true] %s586_s30 }
  0xe9   : > { %718 = vmatpush3.msra.mxu0 %v428_v8  ;;  %v424_v19 = vld [vmem:[%s1099_s3] sm:$0xff]  ;;  %s1051_s17 = scalar_lea.sflag [#allocation4], %s295_s15  ;;  %s795_s27 = scalar_lea.vmem %s1045_s30, 256 }
  0xea   : > { %719 = vmatprep.subr.mxu0 %v427_v9  ;;  %v682_v29 = vld [vmem:[%s1100_s4] ss:$0 sm:$0xff]  ;;  %p796_p13 = scmp.ne.s32.totalorder %s1045_s30, %s795_s27  ;;  %s873_s20 = smov [#allocation3]  }
  0xeb   : > { %v404_v12 = vld [vmem:[#allocation2 + $0x8] sm:$0xff]  ;;  %720 = vmatpush3.msra.mxu0 %v427_v9  ;;  %v685_v55 = vld [vmem:[%s1101_s5] ss:$0 sm:$0xff]  ;;  %s799_s16 = sshll.u32 %s873_s20, 4  ;;  %s800_s16 = int_to_ptr.vmem [resolvable:$false] %s799_s16 }
  0xec   : > { %v413_v15 = vadd.f32 %v681_v13, %v404_v12  ;;  %721 = vmatprep.subr.mxu0 %v426_v11  ;;  %v686_v57 = vld [vmem:[%s1102_s6] ss:$0 sm:$0xff]  ;;  %p797_p0 = pnand %p796_p13, %p956_p4  ;;  %s801_s18 = scalar_lea.vmem %s800_s16, 512 }
  0xed   : > { %v403_v10 = vld [vmem:[#allocation2] sm:$0xff]  ;;  %722 = vmatpush3.msra.mxu0 %v426_v11  ;;  %p802_p2 = scmp.lt.s32.totalorder %s1045_s30, %s800_s16  ;;  %p803_p3 = scmp.lt.s32.totalorder %s801_s18, %s795_s27 }
  0xee   : > { %v412_v14 = vadd.f32 %v681_v13, %v403_v10  ;;  %v417_v18 = vmul.f32 0.70710677, %v413_v15  ;;  %723 = vmatprep.subr.mxu0 %v425_v16  ;;  %v415_v22 = vmul.f32 0.5, %v413_v15  ;;  %p798_p1 = pneg %p797_p0 }
  0xef   : > { %724 = vmatpush3.msra.mxu0 %v425_v16  ;;  %p804_p5 = por %p803_p3, %p802_p2 }
  0xf0   : > { %v416_v17 = vmul.f32 0.70710677, %v412_v14  ;;  %725 = vmatprep.subr.mxu0 %v424_v19  ;;  %v414_v20 = vmul.f32 0.5, %v412_v14 }
  0xf1   : > { %726 = vmatpush3.msra.mxu0 %v424_v19  ;;  %p805_p6 = pnand %p804_p5, %p798_p1 }
  0xf2   : > { %787 = verf.f32 %v416_v17 }
  0xf3   : > { %789 = verf.f32 %v417_v18 }
  0xff   : > { %v788_v21 = vpop.eup %787 }
 0x100   : > { %v790_v23 = vpop.eup %789  ;;  %v420_v24 = vadd.f32 1.0, %v788_v21 }
 0x101   : > { %v421_v25 = vadd.f32 1.0, %v790_v23 }
 0x102   : > { %v422_v26 = vmul.f32 %v420_v24, %v414_v20 }
 0x103   : > { %v423_v27 = vmul.f32 %v421_v25, %v415_v22 }
 0x104   : > { %727 = vmatprep.mubr.msk.f32.mxu0 %vm436_vm2, %v422_v26 }
 0x105   : > { %728 = vmatmul.mubr.msk.f32.vlgmr.msra.gmra.mxu0 %vm436_vm2, %v423_v27 }
 0x1c5   : > { %v729_v28 = vpop.f32.mrf.mxu0 }
 0x1c6   : > { %v515_v31 = vadd.f32 %v729_v28, %v682_v29 }
 0x1c7   : > { %v509_v30 = vpop.f32.mrf.mxu0 }
 0x1c8   : > { %v510_v32 = vadd.f32 %v682_v29, %v509_v30  ;;  %v529_v36 = vmul.f32 %v515_v31, %v515_v31  ;;  %v522_v37 = vsel %vm518_vm3, %v515_v31, 0.0 }
 0x1ca   : > { %v519_v33 = vsel %vm518_vm3, %v510_v32, 0.0  ;;  %v528_v34 = vmul.f32 %v510_v32, %v510_v32  ;;  %v533_v38 = vsel %vm518_vm3, %v529_v36, 0.0 }
 0x1cb   : > { %520 = vadd.xlane.f32.xlu0 %v519_v33 }
 0x1cc   : > { %v530_v35 = vsel %vm518_vm3, %v528_v34, 0.0 }
 0x1cd   : > { %531 = vadd.xlane.f32.xlu1 %v530_v35 }
 0x1cf   : > { %523 = vadd.xlane.f32.xlu0 %v522_v37 }
 0x1d1   : > { %534 = vadd.xlane.f32.xlu1 %v533_v38 }
 0x254   : > { %v521_v39 = vpop.xlane.xlu0 %520 }
 0x255   : > { %v526_v40 = vmul.f32 0.03125, %v521_v39 }
 0x256   : > { %v532_v41 = vpop.xlane.xlu1 %531 }
 0x257   : > { %v538_v42 = vmul.f32 %v526_v40, %v526_v40  ;;  %v536_v43 = vmul.f32 0.03125, %v532_v41  ;;  %v542_v53 = vsub.f32 %v510_v32, %v526_v40 }
 0x258   : > { %v524_v44 = vpop.xlane.xlu0 %523 }
 0x259   : > { %v540_v45 = vsub.f32 %v536_v43, %v538_v42  ;;  %v527_v46 = vmul.f32 0.03125, %v524_v44 }
 0x25a   : > { %v535_v47 = vpop.xlane.xlu1 %534 }
 0x25b   : > { %v544_v48 = vadd.f32 1e-05, %v540_v45  ;;  %v539_v49 = vmul.f32 %v527_v46, %v527_v46  ;;  %v537_v50 = vmul.f32 0.03125, %v535_v47  ;;  %v543_v58 = vsub.f32 %v515_v31, %v527_v46 }
 0x25d   : > { %791 = vrsqrt.f32 %v544_v48  ;;  %v541_v51 = vsub.f32 %v537_v50, %v539_v49 }
 0x25f   : > { %v545_v52 = vadd.f32 1e-05, %v541_v51 }
 0x261   : > { %793 = vrsqrt.f32 %v545_v52 }
 0x26a   : > { %v792_v54 = vpop.eup %791 }
 0x26b   : > { %v548_v56 = vmul.f32 %v792_v54, %v542_v53 }
 0x26d   : > { %v557_v59 = vmul.f32 %v685_v55, %v548_v56 }
 0x26e   : > { %v794_v60 = vpop.eup %793 }
 0x26f   : > { %v549_v61 = vmul.f32 %v794_v60, %v543_v58  ;;  %v566_v62 = vadd.f32 %v686_v57, %v557_v59 }
 0x271   : > { %v558_v63 = vmul.f32 %v685_v55, %v549_v61  ;;  %568 = vst.msk [vmem:[%s982_s21] sm:$0xff] %vm518_vm3, %v566_v62 }
 0x273   : > { %v567_v0 = vadd.f32 %v686_v57, %v558_v63 }
 0x275   : > { %569 = vst.msk [vmem:[%s982_s21 + $0x8] sm:$0xff] %vm518_vm3, %v567_v0 }
 0x276   : > { %808 = shalt.err (!%p805_p6)
}
 0x277   : > { %s809_s15 = scalar_lea.hbm %s1043_s12, 256  ;;  %s813_s22 = scalar_lea.hbm %s1103_s7, 768 }
 0x278   : > { %p810_p7 = scmp.ne.s32.totalorder %s1043_s12, %s809_s15  ;;  %p814_p11 = scmp.lt.s32.totalorder %s1043_s12, %s1103_s7 }
 0x279   : > { %p815_p12 = scmp.lt.s32.totalorder %s813_s22, %s809_s15 }
 0x27a   : > { %p811_p9 = pnand %p810_p7, %p956_p4 }
 0x27b   : > { %p816_p13 = por %p815_p12, %p814_p11 }
 0x27c   : > { %p812_p10 = pneg %p811_p9 }
 0x27e   : > { %p817_p0 = pnand %p816_p13, %p812_p10 }
 0x280   : > { %820 = shalt.err (!%p817_p0)
}
 0x281   : > { %s874_s10 = smov 128   ;;  %s875_s27 = smov 8  }
 0x282   : > { %730 = dma.vmem_to_hbm [thread:$0]  (%p956_p4), %s1045_s30, 256, %s1043_s12, %s1051_s17, %s874_s10, %s874_s10, %s875_s27  }
 0x283 PF: > { %p736_p1 = scmp.ge.s32.totalorder %s871_s29, 2  ;;  %s601_s20 = sand.u32 1, %s851_s24  }
 0x284   : > { %s602_s16 = scalar_lea.sflag [#allocation4], %s601_s20 }
 0x285   : > { %p733_p2 = pnand %p736_p1, %p963_p8 }
 0x287   : > { %p734_p3 = pneg %p733_p2 }
 0x289   : > { %846 = dma.done.wait (%p734_p3), %s602_s16, 256  }
 0x28a   : > { %848 = vsyncadd (%p734_p3), %s602_s16, 4294967040  ;;  %s20_s29 = sadd.s32 1, %s871_s29   ;;  %s1106_s24 = smov %s855_s25 }
 0x28b   : > { %p17_p5 = scmp.ge.s32.totalorder %s20_s29, 5   ;;  %s1107_s25 = smov %s859_s26 }
 0x28c   : > { %s1108_s26 = smov %s969_s14  ;;  %s1109_s27 = smov %s867_s28 }
 0x28d   : > { %s1110_s28 = smov %s1112_s9  ;;  %19 = sbr.rel (!%p17_p5) target bundleno = 4 (0x4), region = 90 }
 0x292   :  { %607 = vsyncpa [#allocation4], 1 }
 0x293   :  { %609 = vsyncpa [#allocation4 + $0x1], 1 }

</bundles_post_ra>
